<compile_context>
chip_gen: v5e
topology: v5e:2x2
jax: 0.10.0
libtpu: 0.0.40
codegen_flags: <defaults>
</compile_context>

<pallas_src>
import functools

import jax
import jax.numpy as jnp
from jax import lax
from jax.experimental import pallas as pl
from jax.experimental.pallas import tpu as pltpu


def _round_up(x: int, m: int) -> int:
    return ((x + m - 1) // m) * m


def _cdiv(a: int, b: int) -> int:
    return -(-a // b)


def _sublane(itemsize: int) -> int:
    # Native sublane packing: f32 -> 8, bf16 -> 16, int8/fp8 -> 32.
    return {4: 8, 2: 16, 1: 32}.get(itemsize, 8)


# ---------------------------------------------------------------------------
# Kernels.  w is in its native (N, K) layout; dot_general contracts dim 1 of
# both operands (MXU handles the transposed RHS natively -> no transpose).
# ---------------------------------------------------------------------------
def _linear_kernel_f32(x_ref, w_ref, b_ref, o_ref):
    """f32 output: accumulate directly into the resident output block."""
    k = pl.program_id(2)

    @pl.when(k == 0)
    def _init():
        # Bias added exactly once, by seeding the accumulator with it.
        o_ref[...] = jnp.broadcast_to(b_ref[...].astype(jnp.float32), o_ref.shape)

    o_ref[...] += lax.dot_general(
        x_ref[...], w_ref[...],
        dimension_numbers=(((1,), (1,)), ((), ())),
        preferred_element_type=jnp.float32,
    )


def _linear_kernel_acc(x_ref, w_ref, b_ref, o_ref, acc_ref):
    """Low-precision output: f32 VMEM accumulator, cast once at finalize."""
    k = pl.program_id(2)

    @pl.when(k == 0)
    def _init():
        acc_ref[...] = jnp.zeros_like(acc_ref)

    acc_ref[...] += lax.dot_general(
        x_ref[...], w_ref[...],
        dimension_numbers=(((1,), (1,)), ((), ())),
        preferred_element_type=jnp.float32,
    )

    @pl.when(k == pl.num_programs(2) - 1)
    def _finalize():
        out = acc_ref[...] + b_ref[...].astype(jnp.float32)
        o_ref[...] = out.astype(o_ref.dtype)


# ---------------------------------------------------------------------------
# Tile selection (generation-aware-ish: sized to fit comfortably even in
# v7x's 64 MiB VMEM with double buffering; lane dims multiples of 128).
# ---------------------------------------------------------------------------
def _pick_tiles(M: int, K: int, N: int, itemsize: int):
    if itemsize <= 2:                      # bf16 / fp8
        tm_max, tn_max, tk_max = 512, 1024, 2048
    else:                                  # f32
        tm_max, tn_max, tk_max = 512, 512, 1024

    sub = _sublane(itemsize)
    tm = min(tm_max, _round_up(M, sub))
    tn = min(tn_max, _round_up(N, 128))

    # K tiling: a single K step needs no padding at all; otherwise pick the
    # largest 128-multiple <= tk_max that divides round_up(K, 128) so padding
    # along K is at most 127 elements.
    if K <= tk_max:
        tk, Kp = K, K
    else:
        Kp = _round_up(K, 128)
        tk = 128
        for cand in range(tk_max, 127, -128):
            if Kp % cand == 0:
                tk = cand
                break

    # Ensure >= 2 parallel output blocks when the shape allows it (v7x: 2 TCs).
    if _cdiv(M, tm) * _cdiv(N, tn) < 2:
        if _round_up(N, 128) >= 256:
            tn = _round_up(_round_up(N, 128) // 2, 128)
        elif _round_up(M, sub) >= 2 * sub:
            tm = _round_up(_round_up(M, sub) // 2, sub)

    return tm, tn, tk, Kp


@functools.partial(jax.jit, static_argnames=("tm", "tn", "tk"))
def pallas_linear(x, w, b, *, tm=None, tn=None, tk=None):
    """y = x @ w.T + b, matching torch.nn.functional.linear(x, w, b)."""
    orig_shape = x.shape
    K = orig_shape[-1]
    x2 = x.reshape(-1, K)
    M = x2.shape[0]
    N, Kw = w.shape
    assert K == Kw, "in_features mismatch"
    assert b.shape == (N,), "bias shape mismatch"

    out_dtype = x.dtype
    itemsize = jnp.dtype(out_dtype).itemsize

    a_tm, a_tn, a_tk, Kp = _pick_tiles(M, K, N, itemsize)
    if tm is not None:
        a_tm = tm
    if tn is not None:
        a_tn = tn
    if tk is not None:
        a_tk = tk
        Kp = _round_up(K, a_tk)
    assert a_tk == Kp or (a_tk % 128 == 0 and Kp % a_tk == 0), "bad K tile"

    # Only the reduction (K) axis ever needs zero padding for correctness.
    # M/N edge tiles are handled by Pallas's masked edge-block loads/stores.
    if Kp != K:
        x2 = jnp.pad(x2, ((0, 0), (0, Kp - K)))
        w2 = jnp.pad(w, ((0, 0), (0, Kp - K)))
    else:
        w2 = w
    b2 = b.reshape(1, N)

    grid = (_cdiv(M, a_tm), _cdiv(N, a_tn), Kp // a_tk)
    gm, gn, gk = grid

    # VMEM budget: raise above the conservative scoped default, but stay well
    # under physical capacity (v7x has only 64 MiB per TensorCore).
    try:
        vmem_cap = int(pltpu.get_tpu_info().vmem_capacity_bytes)
    except Exception:
        vmem_cap = 64 * 1024 * 1024
    vmem_limit = int(min(vmem_cap * 3 // 4, 96 * 1024 * 1024))

    # Truthful traffic estimate: x re-read per N-tile, w re-read per M-tile.
    cost = pl.CostEstimate(
        flops=2 * M * N * Kp,
        transcendentals=0,
        bytes_accessed=(M * Kp * gn + Kp * N * gm + M * N + N) * itemsize,
    )

    in_specs = [
        pl.BlockSpec((a_tm, a_tk), lambda i, j, k: (i, k)),   # x  (M, K) tile
        pl.BlockSpec((a_tn, a_tk), lambda i, j, k: (j, k)),   # w  (N, K) tile, native layout
        pl.BlockSpec((1, a_tn), lambda i, j, k: (0, j)),      # bias (1, N) tile
    ]
    out_spec = pl.BlockSpec((a_tm, a_tn), lambda i, j, k: (i, j))

    if jnp.dtype(out_dtype) == jnp.dtype(jnp.float32):
        kernel = _linear_kernel_f32
        scratch = []
    else:
        kernel = _linear_kernel_acc
        scratch = [pltpu.VMEM((a_tm, a_tn), jnp.float32)]

    out2 = pl.pallas_call(
        kernel,
        out_shape=jax.ShapeDtypeStruct((M, N), out_dtype),
        grid_spec=pltpu.PrefetchScalarGridSpec(
            num_scalar_prefetch=0,
            grid=grid,
            in_specs=in_specs,
            out_specs=out_spec,
            scratch_shapes=scratch,
        ),
        compiler_params=pltpu.CompilerParams(
            dimension_semantics=("parallel", "parallel", "arbitrary"),
            vmem_limit_bytes=vmem_limit,
        ),
        cost_estimate=cost,
    )(x2, w2, b2)

    return out2.reshape(orig_shape[:-1] + (N,))


if __name__ == "__main__":
    key = jax.random.PRNGKey(0)
    kx, kw, kb = jax.random.split(key, 3)

    # --- small test matching the module's forward (batch=8, in=32, out=16) ---
    batch, in_features, out_features = 8, 32, 16
    x = jax.random.normal(kx, (batch, in_features), dtype=jnp.float32)
    w = jax.random.normal(kw, (out_features, in_features), dtype=jnp.float32)
    b = jax.random.normal(kb, (out_features,), dtype=jnp.float32)

    y = pallas_linear(x, w, b)
    jax.block_until_ready(y)
    y_ref = jnp.dot(x, w.T, precision=lax.Precision.HIGHEST) + b
    assert y.shape == (batch, out_features)
    assert jnp.allclose(y, y_ref, atol=1e-5, rtol=1e-5), "mismatch (small)"

    # --- multi-block path: edge-masked M/N tiles, multi-K steps, K padding ---
    k2x, k2w, k2b = jax.random.split(jax.random.PRNGKey(1), 3)
    M2, K2, N2 = 72, 320, 200
    x2 = jax.random.normal(k2x, (M2, K2), dtype=jnp.float32)
    w2 = jax.random.normal(k2w, (N2, K2), dtype=jnp.float32)
    b2 = jax.random.normal(k2b, (N2,), dtype=jnp.float32)
    y2_ref = jnp.dot(x2, w2.T, precision=lax.Precision.HIGHEST) + b2

    y2 = pallas_linear(x2, w2, b2)                          # default tiles
    y3 = pallas_linear(x2, w2, b2, tm=32, tn=128, tk=128)   # grid (3,2,3), K padded
    jax.block_until_ready((y2, y3))
    assert jnp.allclose(y2, y2_ref, atol=1e-2, rtol=1e-2), "mismatch (default tiles)"
    assert jnp.allclose(y3, y2_ref, atol=1e-2, rtol=1e-2), "mismatch (tiled + K pad)"

    # --- bf16 path (exercises the scratch-accumulator kernel) ---
    xb, wb, bb = (a.astype(jnp.bfloat16) for a in (x2, w2, b2))
    yb = pallas_linear(xb, wb, bb)
    jax.block_until_ready(yb)
    yb_ref = (jnp.dot(xb.astype(jnp.float32), wb.astype(jnp.float32).T)
              + bb.astype(jnp.float32))
    assert jnp.allclose(yb.astype(jnp.float32), yb_ref, atol=5e-2, rtol=5e-2), \
        "mismatch (bf16)"

    print("KERNEL_OK")
</pallas_src>

<mosaic_0001>
module attributes {stable_mosaic.version = 11 : i64} {
  func.func @_linear_kernel_f32(%arg0: i32, %arg1: i32, %arg2: i32, %arg3: memref<8x32xf32, #tpu.memory_space<vmem>>, %arg4: memref<128x32xf32, #tpu.memory_space<vmem>>, %arg5: memref<1x128xf32, #tpu.memory_space<vmem>>, %arg6: memref<8x128xf32, #tpu.memory_space<vmem>>) attributes {dimension_semantics = [#tpu.dimension_semantics<parallel>, #tpu.dimension_semantics<parallel>, #tpu.dimension_semantics<arbitrary>], iteration_bounds = array<i64: 1, 1, 1>, scalar_prefetch = 0 : i64, scratch_operands = 0 : i64, tpu.core_type = #tpu.core_type<tc>, window_params = [{transform_indices = @transform_0, window_bounds = array<i64: 8, 32>}, {transform_indices = @transform_1, window_bounds = array<i64: 128, 32>}, {transform_indices = @transform_2, window_bounds = array<i64: 1, 128>}, {transform_indices = @transform_3, window_bounds = array<i64: 8, 128>}]} {
    %c0_i32 = arith.constant 0 : i32
    %0 = arith.cmpi eq, %arg2, %c0_i32 : i32
    %1 = arith.extui %0 : i1 to i32
    %c0_i32_0 = arith.constant 0 : i32
    %2 = arith.cmpi ne, %1, %c0_i32_0 : i32
    scf.if %2 {
      %c0_8 = arith.constant 0 : index
      %c0_9 = arith.constant 0 : index
      %9 = vector.load %arg5[%c0_8, %c0_9] : memref<1x128xf32, #tpu.memory_space<vmem>>, vector<1x128xf32>
      %10 = vector.shape_cast %9 : vector<1x128xf32> to vector<1x128xf32>
      %11 = vector.broadcast %10 : vector<1x128xf32> to vector<8x128xf32>
      %c0_10 = arith.constant 0 : index
      %c0_11 = arith.constant 0 : index
      %12 = vector.load %arg6[%c0_10, %c0_11] : memref<8x128xf32, #tpu.memory_space<vmem>>, vector<8x128xf32>
      tpu.vector_store %arg6[%c0_10, %c0_11], %11 {strides = array<i32>} : memref<8x128xf32, #tpu.memory_space<vmem>>, vector<8x128xf32>,
    } else {
    }
    %c0 = arith.constant 0 : index
    %c0_1 = arith.constant 0 : index
    %3 = vector.load %arg6[%c0, %c0_1] : memref<8x128xf32, #tpu.memory_space<vmem>>, vector<8x128xf32>
    %c0_2 = arith.constant 0 : index
    %c0_3 = arith.constant 0 : index
    %4 = vector.load %arg3[%c0_2, %c0_3] : memref<8x32xf32, #tpu.memory_space<vmem>>, vector<8x32xf32>
    %c0_4 = arith.constant 0 : index
    %c0_5 = arith.constant 0 : index
    %5 = vector.load %arg4[%c0_4, %c0_5] : memref<128x32xf32, #tpu.memory_space<vmem>>, vector<128x32xf32>
    %cst = arith.constant dense<0.000000e+00> : vector<8x128xf32>
    %6 = tpu.matmul %4, %5, %cst {dimension_numbers = #tpu.dot_dimension_numbers<[1], [1], [0], [0], [0, 0, 1, 0], [], []>} : vector<8x32xf32>, vector<128x32xf32>, vector<8x128xf32> -> vector<8x128xf32>
    %7 = arith.addf %3, %6 : vector<8x128xf32>
    %c0_6 = arith.constant 0 : index
    %c0_7 = arith.constant 0 : index
    %8 = vector.load %arg6[%c0_6, %c0_7] : memref<8x128xf32, #tpu.memory_space<vmem>>, vector<8x128xf32>
    tpu.vector_store %arg6[%c0_6, %c0_7], %7 {strides = array<i32>} : memref<8x128xf32, #tpu.memory_space<vmem>>, vector<8x128xf32>,
    return
  }
  func.func @transform_0(%arg0: i32, %arg1: i32, %arg2: i32) -> (i32, i32) {
    %c0_i32 = arith.constant 0 : i32
    return %arg0, %arg2 : i32, i32
  }
  func.func @transform_1(%arg0: i32, %arg1: i32, %arg2: i32) -> (i32, i32) {
    %c0_i32 = arith.constant 0 : i32
    return %arg1, %arg2 : i32, i32
  }
  func.func @transform_2(%arg0: i32, %arg1: i32, %arg2: i32) -> (i32, i32) {
    %c0_i32 = arith.constant 0 : i32
    %c0_i32_0 = arith.constant 0 : i32
    return %c0_i32, %arg1 : i32, i32
  }
  func.func @transform_3(%arg0: i32, %arg1: i32, %arg2: i32) -> (i32, i32) {
    %c0_i32 = arith.constant 0 : i32
    return %arg0, %arg1 : i32, i32
  }
}

</mosaic_0001>

<bundles_post_ra>
// kernel: pallas_linear.1
= control target key start
LH: loop header
LB: loop body
LE: loop exit
PB: predicated region body
PF: predicated region fallthrough
CT: control target
= control target key end

     0   :  { %8 = vsyncpa [#allocation3], 0  ;;  %s319_s0 = inlined_call_operand.hbm [shape: f32[8,32], index: 0, kind: input, shape index: {}]   ;;  %s320_s1 = inlined_call_operand.hbm [shape: f32[16,32], index: 1, kind: input, shape index: {}]   ;;  %s321_s2 = inlined_call_operand.vmem [shape: f32[1,16], index: 2, kind: input, shape index: {}]   ;;  %s322_s3 = inlined_call_operand.hbm [shape: f32[8,16], index: 3, kind: output, shape index: {}]  }
   0x1   :  { %9 = vsyncpa [#allocation6], 0 }
   0x2   :  { %10 = vsyncpa [#allocation4], 0  ;;  %s16_s14 = sshll.u32 %s319_s0, 4  ;;  %s265_s15 = smov [#allocation2]   ;;  %s17_s14 = int_to_ptr.hbm [resolvable:$true] %s16_s14 }
   0x3   :  { %s18_s16 = sshll.u32 %s265_s15, 4  ;;  %s19_s16 = int_to_ptr.vmem [resolvable:$true] %s18_s16 }
   0x4   :  { %21 = dma.hbm_to_vmem [thread:$0]  %s17_s14, 128, %s19_s16, [#allocation3]  }
   0x5   :  { %25 = vsyncadd [#allocation6], 1792  ;;  %s26_s19 = sshll.u32 %s320_s1, 4  ;;  %s266_s20 = smov [#allocation5]   ;;  %s27_s19 = int_to_ptr.hbm [resolvable:$true] %s26_s19 }
   0x6   :  { %s28_s21 = sshll.u32 %s266_s20, 4  ;;  %s267_s22 = smov 128   ;;  %s29_s21 = int_to_ptr.vmem [resolvable:$true] %s28_s21 }
   0x7   :  { %s268_s23 = smov 8  }
   0x8   :  { %34 = dma.hbm_to_vmem [thread:$0]  %s27_s19, 256, %s29_s21, [#allocation6], %s267_s22, %s267_s22, %s268_s23  }
   0x9   :  { %259 = dma.done.wait [#allocation3], 128  }
   0xa   :  { %260 = vsyncadd [#allocation3], 4294967168 }
   0xb   :  { %261 = dma.done.wait [#allocation6], 2048  }
   0xc   :  { %262 = vsyncadd [#allocation6], 4294965248  ;;  %vm72_vm0 = vcmask 261120   ;;  %v71_v0 = vld [vmem:[#allocation5 + $0x78] sm:$0xff]  ;;  %v70_v1 = vld [vmem:[#allocation5 + $0x70] sm:$0xff]  ;;  %s269_s24 = smov [#allocation7]  }
   0xd   :  { %164 = vmatpush.xpose.msk.msra.mxu0 %vm72_vm0, %v71_v0  ;;  %v69_v2 = vld [vmem:[#allocation5 + $0x68] sm:$0xff]  ;;  %v68_v3 = vld [vmem:[#allocation5 + $0x60] sm:$0xff]  ;;  %v67_v4 = vld [vmem:[#allocation5 + $0x58] sm:$0xff]  ;;  %s151_s25 = sshll.u32 %s269_s24, 4  ;;  %s153_s28 = sshll.u32 %s322_s3, 4  ;;  %s152_s25 = int_to_ptr.vmem [resolvable:$true] %s151_s25  ;;  %s154_s28 = int_to_ptr.hbm [resolvable:$true] %s153_s28 }
   0xe   :  { %v66_v5 = vld [vmem:[#allocation5 + $0x50] sm:$0xff]  ;;  %v65_v6 = vld [vmem:[#allocation5 + $0x48] sm:$0xff]  ;;  %v64_v7 = vld [vmem:[#allocation5 + $0x40] sm:$0xff] }
   0xf   :  { %v63_v8 = vld [vmem:[#allocation5 + $0x38] sm:$0xff]  ;;  %v62_v9 = vld [vmem:[#allocation5 + $0x30] sm:$0xff]  ;;  %v61_v10 = vld [vmem:[#allocation5 + $0x28] sm:$0xff] }
  0x10   :  { %v60_v11 = vld [vmem:[#allocation5 + $0x20] sm:$0xff]  ;;  %v59_v12 = vld [vmem:[#allocation5 + $0x18] sm:$0xff]  ;;  %v58_v13 = vld [vmem:[#allocation5 + $0x10] sm:$0xff] }
  0x11   :  { %165 = vmatpush.xpose.msk.msra.mxu0 %vm72_vm0, %v70_v1  ;;  %v57_v14 = vld [vmem:[#allocation5 + $0x8] sm:$0xff]  ;;  %v56_v15 = vld [vmem:[#allocation5] sm:$0xff]  ;;  %v55_v16 = vld [vmem:[#allocation2] sm:$0xff] }
  0x12   :  { %v186_v17 = vld [vmem:[%s321_s2] ss:$0 sm:$0xff] }
  0x15   :  { %166 = vmatpush.xpose.msk.msra.mxu0 %vm72_vm0, %v69_v2 }
  0x19   :  { %167 = vmatpush.xpose.msk.msra.mxu0 %vm72_vm0, %v68_v3 }
  0x1d   :  { %168 = vmatpush.xpose.msk.msra.mxu0 %vm72_vm0, %v67_v4 }
  0x21   :  { %169 = vmatpush.xpose.msk.msra.mxu0 %vm72_vm0, %v66_v5 }
  0x25   :  { %170 = vmatpush.xpose.msk.msra.mxu0 %vm72_vm0, %v65_v6 }
  0x29   :  { %171 = vmatpush.xpose.msk.msra.mxu0 %vm72_vm0, %v64_v7 }
  0x2d   :  { %172 = vmatpush.xpose.msk.msra.mxu0 %vm72_vm0, %v63_v8 }
  0x31   :  { %173 = vmatpush.xpose.msk.msra.mxu0 %vm72_vm0, %v62_v9 }
  0x35   :  { %174 = vmatpush.xpose.msk.msra.mxu0 %vm72_vm0, %v61_v10 }
  0x39   :  { %175 = vmatpush.xpose.msk.msra.mxu0 %vm72_vm0, %v60_v11 }
  0x3d   :  { %176 = vmatpush.xpose.msk.msra.mxu0 %vm72_vm0, %v59_v12 }
  0x41   :  { %177 = vmatpush.xpose.msk.msra.mxu0 %vm72_vm0, %v58_v13 }
  0x45   :  { %178 = vmatpush.xpose.msk.msra.mxu0 %vm72_vm0, %v57_v14 }
  0x49   :  { %179 = vmatpush.xpose.msk.msra.mxu0 %vm72_vm0, %v56_v15 }
  0x4c   :  { %180 = vmatmul.msk.f32.vlgmr.msra.gmra.mxu0 %vm72_vm0, %v55_v16 }
  0xc9   :  { %v141_v18 = vpop.f32.mrf.mxu0 }
  0xca   :  { %v144_v19 = vadd.f32 %v186_v17, %v141_v18 }
  0xcc   :  { %145 = vst [vmem:[#allocation7] sm:$0xff] %v144_v19 }
  0xcd   :  { %156 = dma.vmem_to_hbm [thread:$0]  %s152_s25, 128, %s154_s28, [#allocation4]  }
  0xce   :  { %263 = dma.done.wait [#allocation4], 128  }
  0xcf   :  { %264 = vsyncadd [#allocation4], 4294967168 }
  0xd0   :  { %161 = vsyncpa [#allocation3], 1 }
  0xd1   :  { %162 = vsyncpa [#allocation6], 1 }
  0xd2   :  { %163 = vsyncpa [#allocation4], 1 }

</bundles_post_ra>
